<compile_context>
chip_gen: v7x
topology: tpu7x:2x2x1
jax: 0.10.0
libtpu: 0.0.40
codegen_flags: <defaults>
</compile_context>

<pallas_src>
import functools

import jax
import jax.numpy as jnp
from jax.experimental import pallas as pl
from jax.experimental.pallas import tpu as pltpu


# ----------------------------------------------------------------------------
# In-kernel helpers
# ----------------------------------------------------------------------------
def _ln(x, g, b, eps):
    mean = jnp.mean(x, axis=-1, keepdims=True)
    var = jnp.mean(jnp.square(x - mean), axis=-1, keepdims=True)
    return (x - mean) * jax.lax.rsqrt(var + eps) * g + b


# ----------------------------------------------------------------------------
# Pallas kernels
# ----------------------------------------------------------------------------
def _layernorm_kernel(x_ref, g_ref, b_ref, o_ref, *, eps):
    o_ref[...] = _ln(x_ref[...], g_ref[...], b_ref[...], eps)


def layernorm(x, gamma, beta, eps=1e-12):
    """x: (M, H) layer-normalized over the last axis (f32 in / f32 out)."""
    M, H = x.shape
    kern = functools.partial(_layernorm_kernel, eps=eps)
    return pl.pallas_call(
        kern,
        out_shape=jax.ShapeDtypeStruct((M, H), jnp.float32),
        grid=(1,),
        in_specs=[
            pl.BlockSpec((M, H), lambda i: (0, 0)),
            pl.BlockSpec((1, H), lambda i: (0, 0)),
            pl.BlockSpec((1, H), lambda i: (0, 0)),
        ],
        out_specs=pl.BlockSpec((M, H), lambda i: (0, 0)),
        compiler_params=pltpu.CompilerParams(
            dimension_semantics=("parallel",)),
    )(x, gamma.reshape(1, H), beta.reshape(1, H))


def _qkv_kernel(x_ref, w_ref, b_ref, o_ref):
    # bf16 x bf16 -> f32 accumulate on the MXU, bias in f32, store bf16.
    acc = jnp.dot(x_ref[...].astype(jnp.bfloat16), w_ref[...],
                  preferred_element_type=jnp.float32)
    o_ref[...] = (acc + b_ref[...]).astype(o_ref.dtype)


def fused_qkv(x, w_qkv, b_qkv):
    """x: (M, H) f32 @ w_qkv: (H, 3H) bf16 + b_qkv: (3H,) -> (M, 3H) bf16."""
    M, H = x.shape
    N = w_qkv.shape[1]
    return pl.pallas_call(
        _qkv_kernel,
        out_shape=jax.ShapeDtypeStruct((M, N), jnp.bfloat16),
        grid=(1,),
        in_specs=[
            pl.BlockSpec((M, H), lambda i: (0, 0)),
            pl.BlockSpec((H, N), lambda i: (0, 0)),
            pl.BlockSpec((1, N), lambda i: (0, 0)),
        ],
        out_specs=pl.BlockSpec((M, N), lambda i: (0, 0)),
        compiler_params=pltpu.CompilerParams(
            dimension_semantics=("parallel",)),
    )(x, w_qkv, b_qkv.reshape(1, N))


def _attn_block_kernel(qkv_ref, bias_ref, res_ref, wo_ref, bo_ref,
                       g_ref, b_ref, o_ref, *, n_heads, head_dim, scale, eps):
    """One batch element: all-head SDPA + out-proj + residual + layernorm."""
    H = n_heads * head_dim
    bias = bias_ref[0]                                  # (1, S) additive, f32

    ctx_heads = []
    for h in range(n_heads):                            # static unrolled loop
        q = qkv_ref[0, :, pl.ds(h * head_dim, head_dim)]            # (S, d) bf16
        k = qkv_ref[0, :, pl.ds(H + h * head_dim, head_dim)]        # (S, d) bf16
        v = qkv_ref[0, :, pl.ds(2 * H + h * head_dim, head_dim)]    # (S, d) bf16
        # q @ k^T without materializing a transpose: contract the d axes.
        scores = jax.lax.dot_general(
            q, k, (((1,), (1,)), ((), ())),
            preferred_element_type=jnp.float32) * scale             # (S, S) f32
        scores = scores + bias                                      # key mask
        scores = scores - jnp.max(scores, axis=-1, keepdims=True)
        p = jnp.exp(scores)
        p = p * pl.reciprocal(jnp.sum(p, axis=-1, keepdims=True), approx=True)
        ctx_heads.append(jnp.dot(p.astype(jnp.bfloat16), v,
                                 preferred_element_type=jnp.float32))
    ctx = jnp.concatenate(ctx_heads, axis=-1)                       # (S, H) f32

    proj = jnp.dot(ctx.astype(jnp.bfloat16), wo_ref[...],
                   preferred_element_type=jnp.float32) + bo_ref[...]
    y = res_ref[0] + proj                                           # residual
    o_ref[0] = _ln(y, g_ref[...], b_ref[...], eps)


def attention_block(qkv, attn_bias, residual, wo, bo, ln_g, ln_b,
                    n_heads, eps=1e-12):
    """qkv: (B, S, 3H) bf16; attn_bias: (B, 1, S) f32; residual: (B, S, H) f32."""
    B, S, threeH = qkv.shape
    H = threeH // 3
    d = H // n_heads
    scale = 1.0 / float(d) ** 0.5
    kern = functools.partial(_attn_block_kernel, n_heads=n_heads, head_dim=d,
                             scale=scale, eps=eps)
    return pl.pallas_call(
        kern,
        out_shape=jax.ShapeDtypeStruct((B, S, H), jnp.float32),
        grid=(B,),
        in_specs=[
            pl.BlockSpec((1, S, threeH), lambda b: (b, 0, 0)),
            pl.BlockSpec((1, 1, S), lambda b: (b, 0, 0)),
            pl.BlockSpec((1, S, H), lambda b: (b, 0, 0)),
            pl.BlockSpec((H, H), lambda b: (0, 0)),
            pl.BlockSpec((1, H), lambda b: (0, 0)),
            pl.BlockSpec((1, H), lambda b: (0, 0)),
            pl.BlockSpec((1, H), lambda b: (0, 0)),
        ],
        out_specs=pl.BlockSpec((1, S, H), lambda b: (b, 0, 0)),
        compiler_params=pltpu.CompilerParams(
            dimension_semantics=("parallel",)),
    )(qkv, attn_bias, residual, wo, bo.reshape(1, H),
      ln_g.reshape(1, H), ln_b.reshape(1, H))


def _ffn_block_kernel(x_ref, w1_ref, b1_ref, w2_ref, b2_ref, g_ref, b_ref,
                      o_ref, *, eps):
    x = x_ref[...]                                                  # (M, H) f32
    inter = jnp.dot(x.astype(jnp.bfloat16), w1_ref[...],
                    preferred_element_type=jnp.float32) + b1_ref[...]
    # NOTE: HF BERT's default gelu is the exact erf form; tanh approximation
    # deviates by ~1e-3 and lowers cleanly on the EUP.
    inter = jax.nn.gelu(inter, approximate=True)
    ffn = jnp.dot(inter.astype(jnp.bfloat16), w2_ref[...],
                  preferred_element_type=jnp.float32) + b2_ref[...]
    o_ref[...] = _ln(x + ffn, g_ref[...], b_ref[...], eps)


def ffn_block(x, w1, b1, w2, b2, ln_g, ln_b, eps=1e-12):
    """Fused FFN: LN(x + gelu(x@w1+b1)@w2+b2). Intermediate never leaves VMEM."""
    M, H = x.shape
    I = w1.shape[1]
    kern = functools.partial(_ffn_block_kernel, eps=eps)
    return pl.pallas_call(
        kern,
        out_shape=jax.ShapeDtypeStruct((M, H), jnp.float32),
        grid=(1,),
        in_specs=[
            pl.BlockSpec((M, H), lambda i: (0, 0)),
            pl.BlockSpec((H, I), lambda i: (0, 0)),
            pl.BlockSpec((1, I), lambda i: (0, 0)),
            pl.BlockSpec((I, H), lambda i: (0, 0)),
            pl.BlockSpec((1, H), lambda i: (0, 0)),
            pl.BlockSpec((1, H), lambda i: (0, 0)),
            pl.BlockSpec((1, H), lambda i: (0, 0)),
        ],
        out_specs=pl.BlockSpec((M, H), lambda i: (0, 0)),
        compiler_params=pltpu.CompilerParams(
            dimension_semantics=("parallel",)),
    )(x, w1, b1.reshape(1, I), w2, b2.reshape(1, H),
      ln_g.reshape(1, H), ln_b.reshape(1, H))


def _pooler_kernel(x_ref, w_ref, b_ref, o_ref):
    acc = jnp.dot(x_ref[...].astype(jnp.bfloat16), w_ref[...],
                  preferred_element_type=jnp.float32) + b_ref[...]
    o_ref[...] = jnp.tanh(acc)


def pooler(cls, w, b):
    """cls: (B, H) f32 -> tanh(cls @ w + b)."""
    B, H = cls.shape
    N = w.shape[1]
    return pl.pallas_call(
        _pooler_kernel,
        out_shape=jax.ShapeDtypeStruct((B, N), jnp.float32),
        grid=(1,),
        in_specs=[
            pl.BlockSpec((B, H), lambda i: (0, 0)),
            pl.BlockSpec((H, N), lambda i: (0, 0)),
            pl.BlockSpec((1, N), lambda i: (0, 0)),
        ],
        out_specs=pl.BlockSpec((B, N), lambda i: (0, 0)),
        compiler_params=pltpu.CompilerParams(
            dimension_semantics=("parallel",)),
    )(cls, w, b.reshape(1, N))


# ----------------------------------------------------------------------------
# Deterministic parameter construction (synthetic BERT-like config)
# ----------------------------------------------------------------------------
class Config:
    vocab_size = 64
    type_vocab_size = 2
    max_position_embeddings = 16
    hidden_size = 32
    num_heads = 4
    num_layers = 2
    intermediate_size = 64


def init_params(cfg, key):
    ks = iter(jax.random.split(key, 64))

    def dense(k, fan_in, fan_out):
        # Weights stored in bf16 (MXU-native); biases stay f32.
        w = (jax.random.normal(k, (fan_in, fan_out), jnp.float32) * 0.02
             ).astype(jnp.bfloat16)
        b = jnp.zeros((fan_out,), jnp.float32)
        return w, b

    H, I = cfg.hidden_size, cfg.intermediate_size
    p = {
        "word_emb": jax.random.normal(next(ks), (cfg.vocab_size, H),
                                      jnp.float32) * 0.02,
        "pos_emb": jax.random.normal(next(ks), (cfg.max_position_embeddings, H),
                                     jnp.float32) * 0.02,
        "type_emb": jax.random.normal(next(ks), (cfg.type_vocab_size, H),
                                      jnp.float32) * 0.02,
        "emb_ln_g": jnp.ones((H,), jnp.float32),
        "emb_ln_b": jnp.zeros((H,), jnp.float32),
        "layers": [],
    }
    for _ in range(cfg.num_layers):
        layer = {}
        # Q|K|V fused into a single (H, 3H) projection.
        layer["w_qkv"], layer["b_qkv"] = dense(next(ks), H, 3 * H)
        layer["wo"], layer["bo"] = dense(next(ks), H, H)
        layer["attn_ln_g"] = jnp.ones((H,), jnp.float32)
        layer["attn_ln_b"] = jnp.zeros((H,), jnp.float32)
        layer["w1"], layer["b1"] = dense(next(ks), H, I)
        layer["w2"], layer["b2"] = dense(next(ks), I, H)
        layer["ffn_ln_g"] = jnp.ones((H,), jnp.float32)
        layer["ffn_ln_b"] = jnp.zeros((H,), jnp.float32)
        p["layers"].append(layer)
    p["pooler_w"], p["pooler_b"] = dense(next(ks), H, H)
    return p


# ----------------------------------------------------------------------------
# Forward pass (mirrors TextEncoder.forward)
# ----------------------------------------------------------------------------
def text_encoder_forward(params, cfg, input_ids, attention_mask,
                         token_type_ids, output_mask, layer_id=-1):
    del output_mask  # unpacked but never used by the reference forward
    B, S = input_ids.shape
    H = cfg.hidden_size
    n_heads = cfg.num_heads

    # --- embeddings (gathers are JAX glue; layernorm in Pallas) --------------
    positions = jnp.arange(S)
    emb = (params["word_emb"][input_ids]
           + params["pos_emb"][positions][None, :, :]
           + params["type_emb"][token_type_ids])                    # (B, S, H)
    x2d = layernorm(emb.reshape(B * S, H),
                    params["emb_ln_g"], params["emb_ln_b"])         # (B*S, H)

    # Additive attention bias computed ONCE per forward: 0 keep, -1e9 mask.
    attn_bias = ((attention_mask.astype(jnp.float32) - 1.0) * 1e9
                 ).reshape(B, 1, S)

    all_hidden_states = [x2d.reshape(B, S, H)]

    # --- transformer layers: 3 pallas_calls per layer -------------------------
    for layer in params["layers"]:
        qkv = fused_qkv(x2d, layer["w_qkv"], layer["b_qkv"])        # (B*S,3H) bf16
        x3d = attention_block(
            qkv.reshape(B, S, 3 * H), attn_bias, x2d.reshape(B, S, H),
            layer["wo"], layer["bo"],
            layer["attn_ln_g"], layer["attn_ln_b"], n_heads)        # (B, S, H)
        x2d = x3d.reshape(B * S, H)
        x2d = ffn_block(x2d, layer["w1"], layer["b1"],
                        layer["w2"], layer["b2"],
                        layer["ffn_ln_g"], layer["ffn_ln_b"])       # (B*S, H)
        all_hidden_states.append(x2d.reshape(B, S, H))

    # --- pooler on hidden_states[layer_id][:, 0] ------------------------------
    hidden = all_hidden_states[layer_id]                            # (B, S, H)
    cls = hidden[:, 0, :]                                           # (B, H)
    sent_vecs = pooler(cls, params["pooler_w"], params["pooler_b"]) # (B, H)

    return sent_vecs, tuple(all_hidden_states)


# ----------------------------------------------------------------------------
if __name__ == "__main__":
    cfg = Config()
    key = jax.random.PRNGKey(0)
    pkey, ikey, tkey = jax.random.split(key, 3)

    params = init_params(cfg, pkey)

    B, S = 2, 8
    input_ids = jax.random.randint(ikey, (B, S), 0, cfg.vocab_size, jnp.int32)
    # mask out the last two tokens of the second sequence
    attention_mask = jnp.ones((B, S), jnp.int32).at[1, -2:].set(0)
    token_type_ids = jax.random.randint(tkey, (B, S), 0, cfg.type_vocab_size,
                                        jnp.int32)
    output_mask = jnp.ones((B, S), jnp.int32)   # accepted but unused (as in ref)

    sent_vecs, all_hidden_states = text_encoder_forward(
        params, cfg, input_ids, attention_mask, token_type_ids, output_mask,
        layer_id=-1)

    jax.block_until_ready(sent_vecs)
    jax.block_until_ready(all_hidden_states)

    assert sent_vecs.shape == (B, cfg.hidden_size)
    assert len(all_hidden_states) == cfg.num_layers + 1
    assert all(h.shape == (B, S, cfg.hidden_size) for h in all_hidden_states)
    assert bool(jnp.all(jnp.isfinite(sent_vecs)))
    assert all(bool(jnp.all(jnp.isfinite(h))) for h in all_hidden_states)

    print("KERNEL_OK")
</pallas_src>

<mosaic_0001>
module attributes {stable_mosaic.version = 11 : i64} {
  func.func @_layernorm_kernel(%arg0: i32, %arg1: memref<16x32xf32, #tpu.memory_space<vmem>>, %arg2: memref<1x32xf32, #tpu.memory_space<vmem>>, %arg3: memref<1x32xf32, #tpu.memory_space<vmem>>, %arg4: memref<16x32xf32, #tpu.memory_space<vmem>>) attributes {dimension_semantics = [#tpu.dimension_semantics<parallel>], iteration_bounds = array<i64: 1>, scalar_prefetch = 0 : i64, scratch_operands = 0 : i64, tpu.core_type = #tpu.core_type<tc>, window_params = [{pipeline_mode = #tpu.pipeline_mode<synchronous>, transform_indices = @transform_0, window_bounds = array<i64: 16, 32>}, {pipeline_mode = #tpu.pipeline_mode<synchronous>, transform_indices = @transform_1, window_bounds = array<i64: 1, 32>}, {pipeline_mode = #tpu.pipeline_mode<synchronous>, transform_indices = @transform_2, window_bounds = array<i64: 1, 32>}, {pipeline_mode = #tpu.pipeline_mode<synchronous>, transform_indices = @transform_3, window_bounds = array<i64: 16, 32>}]} {
    %c0 = arith.constant 0 : index
    %c0_0 = arith.constant 0 : index
    %0 = vector.load %arg1[%c0, %c0_0] : memref<16x32xf32, #tpu.memory_space<vmem>>, vector<16x32xf32>
    %c0_1 = arith.constant 0 : index
    %c0_2 = arith.constant 0 : index
    %1 = vector.load %arg2[%c0_1, %c0_2] : memref<1x32xf32, #tpu.memory_space<vmem>>, vector<1x32xf32>
    %c0_3 = arith.constant 0 : index
    %c0_4 = arith.constant 0 : index
    %2 = vector.load %arg3[%c0_3, %c0_4] : memref<1x32xf32, #tpu.memory_space<vmem>>, vector<1x32xf32>
    %cst = arith.constant dense<0.000000e+00> : vector<16xf32>
    %3 = vector.multi_reduction <add>, %0, %cst [1] : vector<16x32xf32> to vector<16xf32>
    %4 = vector.shape_cast %3 : vector<16xf32> to vector<16x1xf32>
    %cst_5 = arith.constant 3.200000e+01 : f32
    %5 = vector.broadcast %cst_5 : f32 to vector<16x1xf32>
    %6 = arith.divf %4, %5 : vector<16x1xf32>
    %7 = vector.broadcast %6 : vector<16x1xf32> to vector<16x32xf32>
    %8 = arith.subf %0, %7 : vector<16x32xf32>
    %9 = arith.mulf %8, %8 : vector<16x32xf32>
    %cst_6 = arith.constant dense<0.000000e+00> : vector<16xf32>
    %10 = vector.multi_reduction <add>, %9, %cst_6 [1] : vector<16x32xf32> to vector<16xf32>
    %11 = vector.shape_cast %10 : vector<16xf32> to vector<16x1xf32>
    %cst_7 = arith.constant 3.200000e+01 : f32
    %12 = vector.broadcast %cst_7 : f32 to vector<16x1xf32>
    %13 = arith.divf %11, %12 : vector<16x1xf32>
    %14 = vector.broadcast %6 : vector<16x1xf32> to vector<16x32xf32>
    %15 = arith.subf %0, %14 : vector<16x32xf32>
    %cst_8 = arith.constant 9.99999996E-13 : f32
    %16 = vector.broadcast %cst_8 : f32 to vector<16x1xf32>
    %17 = arith.addf %13, %16 : vector<16x1xf32>
    %18 = math.rsqrt %17 : vector<16x1xf32>
    %19 = vector.broadcast %18 : vector<16x1xf32> to vector<16x32xf32>
    %20 = arith.mulf %15, %19 : vector<16x32xf32>
    %21 = vector.broadcast %1 : vector<1x32xf32> to vector<16x32xf32>
    %22 = arith.mulf %20, %21 : vector<16x32xf32>
    %23 = vector.broadcast %2 : vector<1x32xf32> to vector<16x32xf32>
    %24 = arith.addf %22, %23 : vector<16x32xf32>
    %c0_9 = arith.constant 0 : index
    %c0_10 = arith.constant 0 : index
    %25 = vector.load %arg4[%c0_9, %c0_10] : memref<16x32xf32, #tpu.memory_space<vmem>>, vector<16x32xf32>
    tpu.vector_store %arg4[%c0_9, %c0_10], %24 {strides = array<i32>} : memref<16x32xf32, #tpu.memory_space<vmem>>, vector<16x32xf32>,
    return
  }
  func.func @transform_0(%arg0: i32) -> (i32, i32) {
    %c0_i32 = arith.constant 0 : i32
    %c0_i32_0 = arith.constant 0 : i32
    %c0_i32_1 = arith.constant 0 : i32
    return %c0_i32, %c0_i32_0 : i32, i32
  }
  func.func @transform_1(%arg0: i32) -> (i32, i32) {
    %c0_i32 = arith.constant 0 : i32
    %c0_i32_0 = arith.constant 0 : i32
    %c0_i32_1 = arith.constant 0 : i32
    return %c0_i32, %c0_i32_0 : i32, i32
  }
  func.func @transform_2(%arg0: i32) -> (i32, i32) {
    %c0_i32 = arith.constant 0 : i32
    %c0_i32_0 = arith.constant 0 : i32
    %c0_i32_1 = arith.constant 0 : i32
    return %c0_i32, %c0_i32_0 : i32, i32
  }
  func.func @transform_3(%arg0: i32) -> (i32, i32) {
    %c0_i32 = arith.constant 0 : i32
    %c0_i32_0 = arith.constant 0 : i32
    %c0_i32_1 = arith.constant 0 : i32
    return %c0_i32, %c0_i32_0 : i32, i32
  }
}

</mosaic_0001>

<bundles_post_ra>
// kernel: tpu_custom_call.1
= control target key start
LH: loop header
LB: loop body
LE: loop exit
PB: predicated region body
PF: predicated region fallthrough
CT: control target
= control target key end

     0   :  { %8 = vsyncpa [#allocation3], 0  ;;  %s220_s0 = inlined_call_operand.hbm [shape: f32[16,32], index: 0, kind: input, shape index: {}]   ;;  %s221_s1 = inlined_call_operand.vmem [shape: f32[1,32], index: 1, kind: input, shape index: {}]   ;;  %s222_s2 = inlined_call_operand.vmem [shape: f32[1,32], index: 2, kind: input, shape index: {}]   ;;  %s223_s3 = inlined_call_operand.hbm [shape: f32[16,32], index: 3, kind: output, shape index: {}]  }
   0x1   :  { %9 = vsyncpa [#allocation4], 0  ;;  %s154_s12 = smov [#allocation2]   ;;  %s106_s16 = scalar_lea.hbm %s220_s0, 256 }
   0x2   :  { %s15_s13 = sshll.u32 %s154_s12, 4  ;;  %p107_p0 = scmp.ne.s32.totalorder %s220_s0, %s106_s16  ;;  %s16_s13 = int_to_ptr.vmem [resolvable:$true] %s15_s13 }
   0x3   :  { %p110_p1 = scmp.lt.u32.totalorder %s106_s16, %s220_s0 }
   0x5   :  { %p112_p2 = pnand %p110_p1, %p107_p0 }
   0x7   :  { %115 = shalt.err (!%p112_p2)
}
   0x8   :  { %s116_s21 = scalar_lea.vmem %s16_s13, 256  ;;  %p121_p4 = scmp.lt.s32.totalorder %s16_s13, %s16_s13 }
   0x9   :  { %p117_p3 = scmp.ne.s32.totalorder %s16_s13, %s116_s21  ;;  %p122_p5 = scmp.lt.s32.totalorder %s116_s21, %s116_s21 }
   0xb   :  { %p123_p6 = por %p122_p5, %p121_p4 }
   0xd   :  { %p124_p7 = pnand %p123_p6, %p117_p3 }
   0xf   :  { %127 = shalt.err (!%p124_p7)
}
  0x10   :  { %s155_s22 = smov 128   ;;  %s156_s23 = smov 8  }
  0x11   :  { %21 = dma.hbm_to_vmem [thread:$0]  %s220_s0, 256, %s16_s13, [#allocation3], %s155_s22, %s155_s22, %s156_s23  }
  0x12   :  { %150 = dma.done.wait [#allocation3], 256  }
  0x13   :  { %151 = vsyncadd [#allocation3], 4294967040  ;;  %vm33_vm0 = vcmask 261120   ;;  %v29_v0 = vld [vmem:[#allocation2] sm:$0xff]  ;;  %v30_v1 = vld [vmem:[#allocation2 + $0x8] sm:$0xff]  ;;  %s157_s29 = smov [#allocation5]  }
  0x14   :  { %v34_v2 = vsel %vm33_vm0, %v29_v0, 0.0  ;;  %v37_v3 = vsel %vm33_vm0, %v30_v1, 0.0  ;;  %v96_v21 = vld [vmem:[%s221_s1] ss:$0 sm:$0xff]  ;;  %s84_s30 = sshll.u32 %s157_s29, 4  ;;  %s85_s30 = int_to_ptr.vmem [resolvable:$true] %s84_s30 }
  0x15   :  { %35 = vadd.xlane.f32.xlu0 %v34_v2  ;;  %v97_v23 = vld [vmem:[%s222_s2] ss:$0 sm:$0xff]  ;;  %s128_s4 = scalar_lea.vmem %s85_s30, 256  ;;  %p133_p9 = scmp.lt.s32.totalorder %s85_s30, %s85_s30 }
  0x16   :  { %p129_p8 = scmp.ne.s32.totalorder %s85_s30, %s128_s4  ;;  %p134_p10 = scmp.lt.s32.totalorder %s128_s4, %s128_s4 }
  0x18   :  { %p135_p11 = por %p134_p10, %p133_p9 }
  0x19   :  { %38 = vadd.xlane.f32.xlu0 %v37_v3 }
  0x1a   :  { %p136_p12 = pnand %p135_p11, %p129_p8 }
  0xa2   :  { %v36_v4 = vpop.xlane.xlu0 %35 }
  0xa3   :  { %v41_v5 = vmul.f32 0.03125, %v36_v4 }
  0xa5   :  { %v43_v6 = vsub.f32 %v29_v0, %v41_v5 }
  0xa6   :  { %v39_v7 = vpop.xlane.xlu0 %38 }
  0xa7   :  { %v42_v8 = vmul.f32 0.03125, %v39_v7  ;;  %v45_v9 = vmul.f32 %v43_v6, %v43_v6 }
  0xa9   :  { %v44_v10 = vsub.f32 %v30_v1, %v42_v8  ;;  %v47_v11 = vsel %vm33_vm0, %v45_v9, 0.0 }
  0xaa   :  { %48 = vadd.xlane.f32.xlu1 %v47_v11 }
  0xab   :  { %v46_v12 = vmul.f32 %v44_v10, %v44_v10 }
  0xad   :  { %v50_v13 = vsel %vm33_vm0, %v46_v12, 0.0 }
  0xae   :  { %51 = vadd.xlane.f32.xlu1 %v50_v13 }
 0x137   :  { %v49_v14 = vpop.xlane.xlu1 %48 }
 0x138   :  { %v53_v15 = vmul.f32 0.03125, %v49_v14 }
 0x13a   :  { %v55_v16 = vadd.f32 1e-12, %v53_v15 }
 0x13b   :  { %v52_v17 = vpop.xlane.xlu1 %51 }
 0x13c   :  { %102 = vrsqrt.f32 %v55_v16  ;;  %v54_v18 = vmul.f32 0.03125, %v52_v17 }
 0x13e   :  { %v56_v19 = vadd.f32 1e-12, %v54_v18 }
 0x140   :  { %104 = vrsqrt.f32 %v56_v19 }
 0x146   :  { %v103_v20 = vpop.eup %102 }
 0x147   :  { %v59_v22 = vmul.f32 %v103_v20, %v43_v6 }
 0x149   :  { %v67_v24 = vmul.f32 %v96_v21, %v59_v22 }
 0x14a   :  { %v105_v25 = vpop.eup %104 }
 0x14b   :  { %v60_v26 = vmul.f32 %v105_v25, %v44_v10  ;;  %v75_v27 = vadd.f32 %v97_v23, %v67_v24 }
 0x14d   :  { %v68_v28 = vmul.f32 %v96_v21, %v60_v26  ;;  %77 = vst.msk [vmem:[#allocation5] sm:$0xff] %vm33_vm0, %v75_v27 }
 0x14f   :  { %v76_v29 = vadd.f32 %v97_v23, %v68_v28 }
 0x151   :  { %78 = vst.msk [vmem:[#allocation5 + $0x8] sm:$0xff] %vm33_vm0, %v76_v29 }
 0x152   :  { %139 = shalt.err (!%p136_p12)
}
 0x153   :  { %s140_s5 = scalar_lea.hbm %s223_s3, 256 }
 0x154   :  { %p141_p13 = scmp.ne.s32.totalorder %s223_s3, %s140_s5  ;;  %p144_p0 = scmp.lt.u32.totalorder %s140_s5, %s223_s3 }
 0x156   :  { %p146_p1 = pnand %p144_p0, %p141_p13 }
 0x158   :  { %149 = shalt.err (!%p146_p1)
}
 0x159   :  { %90 = dma.vmem_to_hbm [thread:$0]  %s85_s30, 256, %s223_s3, [#allocation4], %s155_s22, %s155_s22, %s156_s23  }
 0x15a   :  { %152 = dma.done.wait [#allocation4], 256  }
 0x15b   :  { %153 = vsyncadd [#allocation4], 4294967040 }
 0x15c   :  { %94 = vsyncpa [#allocation3], 1 }
 0x15d   :  { %95 = vsyncpa [#allocation4], 1 }

</bundles_post_ra>
